<compile_context>
chip_gen: v6e
topology: v6e:2x2x1
jax: 0.10.0
libtpu: 0.0.40
codegen_flags: <defaults>
</compile_context>

<pallas_src>
import functools
import math

import jax
import jax.numpy as jnp
from jax.experimental import pallas as pl
from jax.experimental.pallas import tpu as pltpu

LANE = 128      # vreg lane width
SUBLANE = 8     # vreg sublane count (f32)


def _round_up(x, m):
    return ((x + m - 1) // m) * m


def _gelu_tanh(h):
    # 0.5 * x * (1 + tanh(sqrt(2/pi) * (x + 0.044715 * x^3)))  -- PyTorch GELU module
    c = jnp.float32(math.sqrt(2.0 / math.pi))
    return 0.5 * h * (1.0 + jnp.tanh(c * (h + 0.044715 * (h * h * h))))


def _fused_mlp_kernel(*refs, residual_flags):
    """refs = (x_ref, w0_ref, b0_ref, ..., w4_ref, b4_ref, o_ref).

    Chains all Linear+GELU(+residual) layers on one batch tile; intermediate
    activations never leave vregs/VMEM.
    """
    x_ref = refs[0]
    o_ref = refs[-1]
    wb_refs = refs[1:-1]
    n_layers = len(wb_refs) // 2

    x = x_ref[...].astype(jnp.float32)                      # [tm, K0p] f32
    for l in range(n_layers):
        w_ref = wb_refs[2 * l]                              # [Klp, Nlp] bf16
        b_ref = wb_refs[2 * l + 1]                          # [1,  Nlp]  f32
        h = jnp.dot(x.astype(jnp.bfloat16), w_ref[...],
                    preferred_element_type=jnp.float32)     # MXU, f32 accumulate
        h = h + b_ref[...]
        g = _gelu_tanh(h)                                   # VPU/EUP in f32
        x = (x + g) if residual_flags[l] else g
    o_ref[...] = x.astype(o_ref.dtype)


def fused_deep_nn(x, params, use_shortcut, *, tm_max=512):
    """Forward pass matching ExampleDeepNeuralNetwork.forward, one pallas_call."""
    M, d_in = x.shape
    n_layers = len(params)
    dims = [d_in] + [w.shape[1] for w, _ in params]

    # Residual decision uses the ORIGINAL (unpadded) shapes, as in PyTorch.
    residual_flags = tuple(
        bool(use_shortcut) and dims[l] == dims[l + 1] for l in range(n_layers)
    )

    # Lane-dense padding of every feature dim to a multiple of 128.
    pdims = [_round_up(d, LANE) for d in dims]

    # Batch tiling: rows padded to the sublane multiple, tile <= tm_max rows,
    # grid over batch tiles (weights stay resident via constant index_map).
    Mp = _round_up(max(M, SUBLANE), SUBLANE)
    tm = min(tm_max, Mp)
    Mp = _round_up(Mp, tm)
    grid = (Mp // tm,)

    # Pad inputs/params (zero padding keeps padded lanes exactly zero).
    x_p = jnp.zeros((Mp, pdims[0]), jnp.float32).at[:M, :dims[0]].set(
        x.astype(jnp.float32))

    padded_wb = []
    for l, (w, b) in enumerate(params):
        wp = jnp.zeros((pdims[l], pdims[l + 1]), jnp.bfloat16)
        wp = wp.at[:dims[l], :dims[l + 1]].set(w.astype(jnp.bfloat16))
        bp = jnp.zeros((1, pdims[l + 1]), jnp.float32)
        bp = bp.at[0, :dims[l + 1]].set(b.astype(jnp.float32))
        padded_wb += [wp, bp]

    # BlockSpecs: x / out tiled over batch; weights & biases whole-array,
    # constant index_map so they are fetched once and stay in VMEM.
    in_specs = [pl.BlockSpec((tm, pdims[0]), lambda i: (i, 0))]
    for l in range(n_layers):
        in_specs.append(pl.BlockSpec((pdims[l], pdims[l + 1]), lambda i: (0, 0)))
        in_specs.append(pl.BlockSpec((1, pdims[l + 1]), lambda i: (0, 0)))
    out_specs = pl.BlockSpec((tm, pdims[-1]), lambda i: (i, 0))

    # Advisory cost estimate for XLA's scheduler.
    flops = sum(2 * Mp * pdims[l] * pdims[l + 1] for l in range(n_layers))
    transcendentals = sum(Mp * pdims[l + 1] for l in range(n_layers))
    bytes_accessed = int(
        x_p.size * x_p.dtype.itemsize
        + Mp * pdims[-1] * 4
        + sum(a.size * a.dtype.itemsize for a in padded_wb))

    kernel = functools.partial(_fused_mlp_kernel, residual_flags=residual_flags)

    out_p = pl.pallas_call(
        kernel,
        out_shape=jax.ShapeDtypeStruct((Mp, pdims[-1]), jnp.float32),
        grid=grid,
        in_specs=in_specs,
        out_specs=out_specs,
        compiler_params=pltpu.CompilerParams(
            dimension_semantics=("parallel",)),
        cost_estimate=pl.CostEstimate(
            flops=flops,
            transcendentals=transcendentals,
            bytes_accessed=bytes_accessed),
    )(x_p, *padded_wb)

    # Slice away batch/feature padding.
    return out_p[:M, :dims[-1]]


def init_params(layer_sizes, key):
    """Deterministic init mimicking nn.Linear's uniform(-1/sqrt(fan_in), ...).

    Weights are stored as [in_features, out_features] so the kernel computes
    x @ W + b (equivalent to PyTorch's x @ W.T with W of shape [out, in]).
    """
    params = []
    for i in range(len(layer_sizes) - 1):
        fan_in, fan_out = layer_sizes[i], layer_sizes[i + 1]
        key, kw, kb = jax.random.split(key, 3)
        bound = 1.0 / math.sqrt(fan_in)
        w = jax.random.uniform(kw, (fan_in, fan_out), jnp.float32, -bound, bound)
        b = jax.random.uniform(kb, (fan_out,), jnp.float32, -bound, bound)
        params.append((w, b))
    return params


if __name__ == "__main__":
    # Small shapes consistent with the module: 5 Linear layers, hidden=32.
    layer_sizes = [32, 32, 32, 32, 32, 32]
    use_shortcut = True
    batch = 8

    key = jax.random.PRNGKey(0)
    key, kx = jax.random.split(key)
    x = jax.random.uniform(kx, (batch, layer_sizes[0]), jnp.float32)

    params = init_params(layer_sizes, key)

    out = fused_deep_nn(x, params, use_shortcut)
    out = jax.block_until_ready(out)

    # Pure-JAX f32 reference (same math, outside Pallas).
    def ref_fwd(x, params):
        c = jnp.float32(math.sqrt(2.0 / math.pi))
        for w, b in params:
            h = x @ w + b
            g = 0.5 * h * (1.0 + jnp.tanh(c * (h + 0.044715 * h ** 3)))
            x = x + g if (use_shortcut and x.shape[-1] == w.shape[1]) else g
        return x

    ref = ref_fwd(x, params)
    assert out.shape == (batch, layer_sizes[-1])
    # bf16 MXU operands -> loosened tolerance vs. the pure-f32 reference.
    assert jnp.allclose(out, ref, atol=2e-2, rtol=2e-2), (
        float(jnp.max(jnp.abs(out - ref))))

    print("KERNEL_OK")
</pallas_src>

<mosaic_0001>
module attributes {stable_mosaic.version = 11 : i64} {
  func.func @_fused_mlp_kernel(%arg0: i32, %arg1: memref<8x128xf32, #tpu.memory_space<vmem>>, %arg2: memref<128x128xbf16, #tpu.memory_space<vmem>>, %arg3: memref<1x128xf32, #tpu.memory_space<vmem>>, %arg4: memref<128x128xbf16, #tpu.memory_space<vmem>>, %arg5: memref<1x128xf32, #tpu.memory_space<vmem>>, %arg6: memref<128x128xbf16, #tpu.memory_space<vmem>>, %arg7: memref<1x128xf32, #tpu.memory_space<vmem>>, %arg8: memref<128x128xbf16, #tpu.memory_space<vmem>>, %arg9: memref<1x128xf32, #tpu.memory_space<vmem>>, %arg10: memref<128x128xbf16, #tpu.memory_space<vmem>>, %arg11: memref<1x128xf32, #tpu.memory_space<vmem>>, %arg12: memref<8x128xf32, #tpu.memory_space<vmem>>) attributes {dimension_semantics = [#tpu.dimension_semantics<parallel>], iteration_bounds = array<i64: 1>, scalar_prefetch = 0 : i64, scratch_operands = 0 : i64, tpu.core_type = #tpu.core_type<tc>, window_params = [{transform_indices = @transform_0, window_bounds = array<i64: 8, 128>}, {pipeline_mode = #tpu.pipeline_mode<synchronous>, transform_indices = @transform_1, window_bounds = array<i64: 128, 128>}, {pipeline_mode = #tpu.pipeline_mode<synchronous>, transform_indices = @transform_2, window_bounds = array<i64: 1, 128>}, {pipeline_mode = #tpu.pipeline_mode<synchronous>, transform_indices = @transform_3, window_bounds = array<i64: 128, 128>}, {pipeline_mode = #tpu.pipeline_mode<synchronous>, transform_indices = @transform_4, window_bounds = array<i64: 1, 128>}, {pipeline_mode = #tpu.pipeline_mode<synchronous>, transform_indices = @transform_5, window_bounds = array<i64: 128, 128>}, {pipeline_mode = #tpu.pipeline_mode<synchronous>, transform_indices = @transform_6, window_bounds = array<i64: 1, 128>}, {pipeline_mode = #tpu.pipeline_mode<synchronous>, transform_indices = @transform_7, window_bounds = array<i64: 128, 128>}, {pipeline_mode = #tpu.pipeline_mode<synchronous>, transform_indices = @transform_8, window_bounds = array<i64: 1, 128>}, {pipeline_mode = #tpu.pipeline_mode<synchronous>, transform_indices = @transform_9, window_bounds = array<i64: 128, 128>}, {pipeline_mode = #tpu.pipeline_mode<synchronous>, transform_indices = @transform_10, window_bounds = array<i64: 1, 128>}, {transform_indices = @transform_11, window_bounds = array<i64: 8, 128>}]} {
    %c0 = arith.constant 0 : index
    %c0_0 = arith.constant 0 : index
    %0 = vector.load %arg1[%c0, %c0_0] : memref<8x128xf32, #tpu.memory_space<vmem>>, vector<8x128xf32>
    %1 = arith.truncf %0 : vector<8x128xf32> to vector<8x128xbf16>
    %c0_1 = arith.constant 0 : index
    %c0_2 = arith.constant 0 : index
    %2 = vector.load %arg2[%c0_1, %c0_2] : memref<128x128xbf16, #tpu.memory_space<vmem>>, vector<128x128xbf16>
    %cst = arith.constant dense<0.000000e+00> : vector<8x128xf32>
    %3 = tpu.matmul %1, %2, %cst {dimension_numbers = #tpu.dot_dimension_numbers<[1], [0], [0], [1], [0, 0, 1, 1], [], []>} : vector<8x128xbf16>, vector<128x128xbf16>, vector<8x128xf32> -> vector<8x128xf32>
    %c0_3 = arith.constant 0 : index
    %c0_4 = arith.constant 0 : index
    %4 = vector.load %arg3[%c0_3, %c0_4] : memref<1x128xf32, #tpu.memory_space<vmem>>, vector<1x128xf32>
    %5 = vector.broadcast %4 : vector<1x128xf32> to vector<8x128xf32>
    %6 = arith.addf %3, %5 : vector<8x128xf32>
    %cst_5 = arith.constant 5.000000e-01 : f32
    %7 = vector.broadcast %cst_5 : f32 to vector<8x128xf32>
    %8 = arith.mulf %7, %6 : vector<8x128xf32>
    %9 = arith.mulf %6, %6 : vector<8x128xf32>
    %10 = arith.mulf %9, %6 : vector<8x128xf32>
    %cst_6 = arith.constant 4.471500e-02 : f32
    %11 = vector.broadcast %cst_6 : f32 to vector<8x128xf32>
    %12 = arith.mulf %11, %10 : vector<8x128xf32>
    %13 = arith.addf %6, %12 : vector<8x128xf32>
    %cst_7 = arith.constant 0.797884583 : f32
    %14 = vector.broadcast %cst_7 : f32 to vector<8x128xf32>
    %15 = arith.mulf %14, %13 : vector<8x128xf32>
    %16 = math.tanh %15 : vector<8x128xf32>
    %cst_8 = arith.constant 1.000000e+00 : f32
    %17 = vector.broadcast %cst_8 : f32 to vector<8x128xf32>
    %18 = arith.addf %17, %16 : vector<8x128xf32>
    %19 = arith.mulf %8, %18 : vector<8x128xf32>
    %20 = arith.addf %0, %19 : vector<8x128xf32>
    %21 = arith.truncf %20 : vector<8x128xf32> to vector<8x128xbf16>
    %c0_9 = arith.constant 0 : index
    %c0_10 = arith.constant 0 : index
    %22 = vector.load %arg4[%c0_9, %c0_10] : memref<128x128xbf16, #tpu.memory_space<vmem>>, vector<128x128xbf16>
    %cst_11 = arith.constant dense<0.000000e+00> : vector<8x128xf32>
    %23 = tpu.matmul %21, %22, %cst_11 {dimension_numbers = #tpu.dot_dimension_numbers<[1], [0], [0], [1], [0, 0, 1, 1], [], []>} : vector<8x128xbf16>, vector<128x128xbf16>, vector<8x128xf32> -> vector<8x128xf32>
    %c0_12 = arith.constant 0 : index
    %c0_13 = arith.constant 0 : index
    %24 = vector.load %arg5[%c0_12, %c0_13] : memref<1x128xf32, #tpu.memory_space<vmem>>, vector<1x128xf32>
    %25 = vector.broadcast %24 : vector<1x128xf32> to vector<8x128xf32>
    %26 = arith.addf %23, %25 : vector<8x128xf32>
    %cst_14 = arith.constant 5.000000e-01 : f32
    %27 = vector.broadcast %cst_14 : f32 to vector<8x128xf32>
    %28 = arith.mulf %27, %26 : vector<8x128xf32>
    %29 = arith.mulf %26, %26 : vector<8x128xf32>
    %30 = arith.mulf %29, %26 : vector<8x128xf32>
    %cst_15 = arith.constant 4.471500e-02 : f32
    %31 = vector.broadcast %cst_15 : f32 to vector<8x128xf32>
    %32 = arith.mulf %31, %30 : vector<8x128xf32>
    %33 = arith.addf %26, %32 : vector<8x128xf32>
    %cst_16 = arith.constant 0.797884583 : f32
    %34 = vector.broadcast %cst_16 : f32 to vector<8x128xf32>
    %35 = arith.mulf %34, %33 : vector<8x128xf32>
    %36 = math.tanh %35 : vector<8x128xf32>
    %cst_17 = arith.constant 1.000000e+00 : f32
    %37 = vector.broadcast %cst_17 : f32 to vector<8x128xf32>
    %38 = arith.addf %37, %36 : vector<8x128xf32>
    %39 = arith.mulf %28, %38 : vector<8x128xf32>
    %40 = arith.addf %20, %39 : vector<8x128xf32>
    %41 = arith.truncf %40 : vector<8x128xf32> to vector<8x128xbf16>
    %c0_18 = arith.constant 0 : index
    %c0_19 = arith.constant 0 : index
    %42 = vector.load %arg6[%c0_18, %c0_19] : memref<128x128xbf16, #tpu.memory_space<vmem>>, vector<128x128xbf16>
    %cst_20 = arith.constant dense<0.000000e+00> : vector<8x128xf32>
    %43 = tpu.matmul %41, %42, %cst_20 {dimension_numbers = #tpu.dot_dimension_numbers<[1], [0], [0], [1], [0, 0, 1, 1], [], []>} : vector<8x128xbf16>, vector<128x128xbf16>, vector<8x128xf32> -> vector<8x128xf32>
    %c0_21 = arith.constant 0 : index
    %c0_22 = arith.constant 0 : index
    %44 = vector.load %arg7[%c0_21, %c0_22] : memref<1x128xf32, #tpu.memory_space<vmem>>, vector<1x128xf32>
    %45 = vector.broadcast %44 : vector<1x128xf32> to vector<8x128xf32>
    %46 = arith.addf %43, %45 : vector<8x128xf32>
    %cst_23 = arith.constant 5.000000e-01 : f32
    %47 = vector.broadcast %cst_23 : f32 to vector<8x128xf32>
    %48 = arith.mulf %47, %46 : vector<8x128xf32>
    %49 = arith.mulf %46, %46 : vector<8x128xf32>
    %50 = arith.mulf %49, %46 : vector<8x128xf32>
    %cst_24 = arith.constant 4.471500e-02 : f32
    %51 = vector.broadcast %cst_24 : f32 to vector<8x128xf32>
    %52 = arith.mulf %51, %50 : vector<8x128xf32>
    %53 = arith.addf %46, %52 : vector<8x128xf32>
    %cst_25 = arith.constant 0.797884583 : f32
    %54 = vector.broadcast %cst_25 : f32 to vector<8x128xf32>
    %55 = arith.mulf %54, %53 : vector<8x128xf32>
    %56 = math.tanh %55 : vector<8x128xf32>
    %cst_26 = arith.constant 1.000000e+00 : f32
    %57 = vector.broadcast %cst_26 : f32 to vector<8x128xf32>
    %58 = arith.addf %57, %56 : vector<8x128xf32>
    %59 = arith.mulf %48, %58 : vector<8x128xf32>
    %60 = arith.addf %40, %59 : vector<8x128xf32>
    %61 = arith.truncf %60 : vector<8x128xf32> to vector<8x128xbf16>
    %c0_27 = arith.constant 0 : index
    %c0_28 = arith.constant 0 : index
    %62 = vector.load %arg8[%c0_27, %c0_28] : memref<128x128xbf16, #tpu.memory_space<vmem>>, vector<128x128xbf16>
    %cst_29 = arith.constant dense<0.000000e+00> : vector<8x128xf32>
    %63 = tpu.matmul %61, %62, %cst_29 {dimension_numbers = #tpu.dot_dimension_numbers<[1], [0], [0], [1], [0, 0, 1, 1], [], []>} : vector<8x128xbf16>, vector<128x128xbf16>, vector<8x128xf32> -> vector<8x128xf32>
    %c0_30 = arith.constant 0 : index
    %c0_31 = arith.constant 0 : index
    %64 = vector.load %arg9[%c0_30, %c0_31] : memref<1x128xf32, #tpu.memory_space<vmem>>, vector<1x128xf32>
    %65 = vector.broadcast %64 : vector<1x128xf32> to vector<8x128xf32>
    %66 = arith.addf %63, %65 : vector<8x128xf32>
    %cst_32 = arith.constant 5.000000e-01 : f32
    %67 = vector.broadcast %cst_32 : f32 to vector<8x128xf32>
    %68 = arith.mulf %67, %66 : vector<8x128xf32>
    %69 = arith.mulf %66, %66 : vector<8x128xf32>
    %70 = arith.mulf %69, %66 : vector<8x128xf32>
    %cst_33 = arith.constant 4.471500e-02 : f32
    %71 = vector.broadcast %cst_33 : f32 to vector<8x128xf32>
    %72 = arith.mulf %71, %70 : vector<8x128xf32>
    %73 = arith.addf %66, %72 : vector<8x128xf32>
    %cst_34 = arith.constant 0.797884583 : f32
    %74 = vector.broadcast %cst_34 : f32 to vector<8x128xf32>
    %75 = arith.mulf %74, %73 : vector<8x128xf32>
    %76 = math.tanh %75 : vector<8x128xf32>
    %cst_35 = arith.constant 1.000000e+00 : f32
    %77 = vector.broadcast %cst_35 : f32 to vector<8x128xf32>
    %78 = arith.addf %77, %76 : vector<8x128xf32>
    %79 = arith.mulf %68, %78 : vector<8x128xf32>
    %80 = arith.addf %60, %79 : vector<8x128xf32>
    %81 = arith.truncf %80 : vector<8x128xf32> to vector<8x128xbf16>
    %c0_36 = arith.constant 0 : index
    %c0_37 = arith.constant 0 : index
    %82 = vector.load %arg10[%c0_36, %c0_37] : memref<128x128xbf16, #tpu.memory_space<vmem>>, vector<128x128xbf16>
    %cst_38 = arith.constant dense<0.000000e+00> : vector<8x128xf32>
    %83 = tpu.matmul %81, %82, %cst_38 {dimension_numbers = #tpu.dot_dimension_numbers<[1], [0], [0], [1], [0, 0, 1, 1], [], []>} : vector<8x128xbf16>, vector<128x128xbf16>, vector<8x128xf32> -> vector<8x128xf32>
    %c0_39 = arith.constant 0 : index
    %c0_40 = arith.constant 0 : index
    %84 = vector.load %arg11[%c0_39, %c0_40] : memref<1x128xf32, #tpu.memory_space<vmem>>, vector<1x128xf32>
    %85 = vector.broadcast %84 : vector<1x128xf32> to vector<8x128xf32>
    %86 = arith.addf %83, %85 : vector<8x128xf32>
    %cst_41 = arith.constant 5.000000e-01 : f32
    %87 = vector.broadcast %cst_41 : f32 to vector<8x128xf32>
    %88 = arith.mulf %87, %86 : vector<8x128xf32>
    %89 = arith.mulf %86, %86 : vector<8x128xf32>
    %90 = arith.mulf %89, %86 : vector<8x128xf32>
    %cst_42 = arith.constant 4.471500e-02 : f32
    %91 = vector.broadcast %cst_42 : f32 to vector<8x128xf32>
    %92 = arith.mulf %91, %90 : vector<8x128xf32>
    %93 = arith.addf %86, %92 : vector<8x128xf32>
    %cst_43 = arith.constant 0.797884583 : f32
    %94 = vector.broadcast %cst_43 : f32 to vector<8x128xf32>
    %95 = arith.mulf %94, %93 : vector<8x128xf32>
    %96 = math.tanh %95 : vector<8x128xf32>
    %cst_44 = arith.constant 1.000000e+00 : f32
    %97 = vector.broadcast %cst_44 : f32 to vector<8x128xf32>
    %98 = arith.addf %97, %96 : vector<8x128xf32>
    %99 = arith.mulf %88, %98 : vector<8x128xf32>
    %100 = arith.addf %80, %99 : vector<8x128xf32>
    %c0_45 = arith.constant 0 : index
    %c0_46 = arith.constant 0 : index
    %101 = vector.load %arg12[%c0_45, %c0_46] : memref<8x128xf32, #tpu.memory_space<vmem>>, vector<8x128xf32>
    tpu.vector_store %arg12[%c0_45, %c0_46], %100 {strides = array<i32>} : memref<8x128xf32, #tpu.memory_space<vmem>>, vector<8x128xf32>,
    return
  }
  func.func @transform_0(%arg0: i32) -> (i32, i32) {
    %c0_i32 = arith.constant 0 : i32
    %c0_i32_0 = arith.constant 0 : i32
    return %arg0, %c0_i32 : i32, i32
  }
  func.func @transform_1(%arg0: i32) -> (i32, i32) {
    %c0_i32 = arith.constant 0 : i32
    %c0_i32_0 = arith.constant 0 : i32
    %c0_i32_1 = arith.constant 0 : i32
    return %c0_i32, %c0_i32_0 : i32, i32
  }
  func.func @transform_2(%arg0: i32) -> (i32, i32) {
    %c0_i32 = arith.constant 0 : i32
    %c0_i32_0 = arith.constant 0 : i32
    %c0_i32_1 = arith.constant 0 : i32
    return %c0_i32, %c0_i32_0 : i32, i32
  }
  func.func @transform_3(%arg0: i32) -> (i32, i32) {
    %c0_i32 = arith.constant 0 : i32
    %c0_i32_0 = arith.constant 0 : i32
    %c0_i32_1 = arith.constant 0 : i32
    return %c0_i32, %c0_i32_0 : i32, i32
  }
  func.func @transform_4(%arg0: i32) -> (i32, i32) {
    %c0_i32 = arith.constant 0 : i32
    %c0_i32_0 = arith.constant 0 : i32
    %c0_i32_1 = arith.constant 0 : i32
    return %c0_i32, %c0_i32_0 : i32, i32
  }
  func.func @transform_5(%arg0: i32) -> (i32, i32) {
    %c0_i32 = arith.constant 0 : i32
    %c0_i32_0 = arith.constant 0 : i32
    %c0_i32_1 = arith.constant 0 : i32
    return %c0_i32, %c0_i32_0 : i32, i32
  }
  func.func @transform_6(%arg0: i32) -> (i32, i32) {
    %c0_i32 = arith.constant 0 : i32
    %c0_i32_0 = arith.constant 0 : i32
    %c0_i32_1 = arith.constant 0 : i32
    return %c0_i32, %c0_i32_0 : i32, i32
  }
  func.func @transform_7(%arg0: i32) -> (i32, i32) {
    %c0_i32 = arith.constant 0 : i32
    %c0_i32_0 = arith.constant 0 : i32
    %c0_i32_1 = arith.constant 0 : i32
    return %c0_i32, %c0_i32_0 : i32, i32
  }
  func.func @transform_8(%arg0: i32) -> (i32, i32) {
    %c0_i32 = arith.constant 0 : i32
    %c0_i32_0 = arith.constant 0 : i32
    %c0_i32_1 = arith.constant 0 : i32
    return %c0_i32, %c0_i32_0 : i32, i32
  }
  func.func @transform_9(%arg0: i32) -> (i32, i32) {
    %c0_i32 = arith.constant 0 : i32
    %c0_i32_0 = arith.constant 0 : i32
    %c0_i32_1 = arith.constant 0 : i32
    return %c0_i32, %c0_i32_0 : i32, i32
  }
  func.func @transform_10(%arg0: i32) -> (i32, i32) {
    %c0_i32 = arith.constant 0 : i32
    %c0_i32_0 = arith.constant 0 : i32
    %c0_i32_1 = arith.constant 0 : i32
    return %c0_i32, %c0_i32_0 : i32, i32
  }
  func.func @transform_11(%arg0: i32) -> (i32, i32) {
    %c0_i32 = arith.constant 0 : i32
    %c0_i32_0 = arith.constant 0 : i32
    return %arg0, %c0_i32 : i32, i32
  }
}

</mosaic_0001>

<bundles_post_ra>
// kernel: tpu_custom_call.1
= control target key start
LH: loop header
LB: loop body
LE: loop exit
PB: predicated region body
PF: predicated region fallthrough
CT: control target
= control target key end

     0   :  { %16 = vsyncpa [#allocation3], 0  ;;  %s1323_s0 = inlined_call_operand.hbm [shape: f32[8,128], index: 0, kind: input, shape index: {}]   ;;  %s1324_s1 = inlined_call_operand.hbm [shape: bf16[128,128], index: 1, kind: input, shape index: {}]   ;;  %s1325_s2 = inlined_call_operand.vmem [shape: f32[1,128], index: 2, kind: input, shape index: {}]   ;;  %s1326_s3 = inlined_call_operand.hbm [shape: bf16[128,128], index: 3, kind: input, shape index: {}]   ;;  %s1327_s4 = inlined_call_operand.vmem [shape: f32[1,128], index: 4, kind: input, shape index: {}]   ;;  %s1328_s5 = inlined_call_operand.hbm [shape: bf16[128,128], index: 5, kind: input, shape index: {}]   ;;  %s1329_s6 = inlined_call_operand.vmem [shape: f32[1,128], index: 6, kind: input, shape index: {}]   ;;  %s1330_s7 = inlined_call_operand.hbm [shape: bf16[128,128], index: 7, kind: input, shape index: {}]   ;;  %s1331_s8 = inlined_call_operand.vmem [shape: f32[1,128], index: 8, kind: input, shape index: {}]   ;;  %s1332_s9 = inlined_call_operand.hbm [shape: bf16[128,128], index: 9, kind: input, shape index: {}]   ;;  %s1333_s10 = inlined_call_operand.vmem [shape: f32[1,128], index: 10, kind: input, shape index: {}]   ;;  %s1334_s11 = inlined_call_operand.hbm [shape: f32[8,128], index: 11, kind: output, shape index: {}]  }
   0x1   :  { %17 = vsyncpa [#allocation6], 0 }
   0x2   :  { %18 = vsyncpa [#allocation9], 0 }
   0x3   :  { %19 = vsyncpa [#allocation12], 0 }
   0x4   :  { %20 = vsyncpa [#allocation4], 0  ;;  %s1151_s17 = smov [#allocation5]  }
   0x5   :  { %s36_s18 = sshll.u32 %s1151_s17, 4  ;;  %s37_s18 = int_to_ptr.vmem [resolvable:$true] %s36_s18 }
   0x6   :  { %s1009_s19 = scalar_lea.vmem %s37_s18, 1024  ;;  %p1014_p1 = scmp.lt.s32.totalorder %s37_s18, %s37_s18 }
   0x7   :  { %p1010_p0 = scmp.ne.s32.totalorder %s37_s18, %s1009_s19  ;;  %p1015_p2 = scmp.lt.s32.totalorder %s1009_s19, %s1009_s19 }
   0x9   :  { %p1016_p3 = por %p1015_p2, %p1014_p1 }
   0xb   :  { %p1017_p4 = pnand %p1016_p3, %p1010_p0 }
   0xd   :  { %1020 = shalt.err (!%p1017_p4)
}
   0xe   :  { %s1152_s20 = smov 64   ;;  %s1153_s21 = smov 4  }
   0xf   :  { %42 = dma.hbm_to_vmem [thread:$0]  %s1324_s1, 1024, %s37_s18, [#allocation6], %s1152_s20, %s1152_s20, %s1153_s21  }
  0x10   :  { %s1154_s24 = smov [#allocation8]   ;;  %s1155_s26 = smov [#allocation2]  }
  0x11   :  { %s64_s25 = sshll.u32 %s1154_s24, 4  ;;  %s27_s27 = sshll.u32 %s1155_s26, 4  ;;  %s65_s25 = int_to_ptr.vmem [resolvable:$true] %s64_s25  ;;  %s28_s27 = int_to_ptr.vmem [resolvable:$true] %s27_s27 }
  0x12   :  { %s1029_s28 = scalar_lea.vmem %s65_s25, 1024  ;;  %p1034_p6 = scmp.lt.s32.totalorder %s65_s25, %s65_s25 }
  0x13   :  { %p1030_p5 = scmp.ne.s32.totalorder %s65_s25, %s1029_s28  ;;  %p1035_p7 = scmp.lt.s32.totalorder %s1029_s28, %s1029_s28 }
  0x15   :  { %p1036_p8 = por %p1035_p7, %p1034_p6 }
  0x17   :  { %p1037_p9 = pnand %p1036_p8, %p1030_p5 }
  0x19   :  { %1040 = shalt.err (!%p1037_p9)
}
  0x1a   :  { %70 = dma.hbm_to_vmem [thread:$0]  %s1328_s5, 1024, %s65_s25, [#allocation9], %s1152_s20, %s1152_s20, %s1153_s21  }
  0x1b   :  { %s1049_s1 = scalar_lea.vmem %s28_s27, 128  ;;  %p1054_p11 = scmp.lt.s32.totalorder %s28_s27, %s28_s27 }
  0x1c   :  { %p1050_p10 = scmp.ne.s32.totalorder %s28_s27, %s1049_s1  ;;  %p1055_p12 = scmp.lt.s32.totalorder %s1049_s1, %s1049_s1 }
  0x1e   :  { %p1056_p13 = por %p1055_p12, %p1054_p11 }
  0x20   :  { %p1057_p0 = pnand %p1056_p13, %p1050_p10 }
  0x22   :  { %1060 = shalt.err (!%p1057_p0)
}
  0x23   :  { %30 = dma.hbm_to_vmem [thread:$0]  %s1323_s0, 128, %s28_s27, [#allocation3]  }
  0x24   :  { %s1156_s14 = smov [#allocation7]   ;;  %s1157_s16 = smov [#allocation10]  }
  0x25   :  { %s50_s15 = sshll.u32 %s1156_s14, 4  ;;  %s78_s17 = sshll.u32 %s1157_s16, 4  ;;  %s51_s15 = int_to_ptr.vmem [resolvable:$true] %s50_s15  ;;  %s79_s17 = int_to_ptr.vmem [resolvable:$true] %s78_s17 }
  0x26   :  { %s1069_s18 = scalar_lea.vmem %s51_s15, 1024  ;;  %p1074_p2 = scmp.lt.s32.totalorder %s51_s15, %s51_s15 }
  0x27   :  { %p1070_p1 = scmp.ne.s32.totalorder %s51_s15, %s1069_s18  ;;  %p1075_p3 = scmp.lt.s32.totalorder %s1069_s18, %s1069_s18 }
  0x29   :  { %p1076_p4 = por %p1075_p3, %p1074_p2 }
  0x2b   :  { %p1077_p5 = pnand %p1076_p4, %p1070_p1 }
  0x2d   :  { %1080 = shalt.err (!%p1077_p5)
}
  0x2e   :  { %56 = dma.hbm_to_vmem [thread:$0]  %s1326_s3, 1024, %s51_s15, [#allocation6], %s1152_s20, %s1152_s20, %s1153_s21  }
  0x2f   :  { %s1089_s0 = scalar_lea.vmem %s79_s17, 1024  ;;  %p1094_p7 = scmp.lt.s32.totalorder %s79_s17, %s79_s17 }
  0x30   :  { %p1090_p6 = scmp.ne.s32.totalorder %s79_s17, %s1089_s0  ;;  %p1095_p8 = scmp.lt.s32.totalorder %s1089_s0, %s1089_s0 }
  0x32   :  { %p1096_p9 = por %p1095_p8, %p1094_p7 }
  0x34   :  { %p1097_p10 = pnand %p1096_p9, %p1090_p6 }
  0x36   :  { %1100 = shalt.err (!%p1097_p10)
}
  0x37   :  { %84 = dma.hbm_to_vmem [thread:$0]  %s1330_s7, 1024, %s79_s17, [#allocation9], %s1152_s20, %s1152_s20, %s1153_s21  }
  0x38   :  { %s1158_s24 = smov [#allocation11]  }
  0x39   :  { %s92_s25 = sshll.u32 %s1158_s24, 4  ;;  %s93_s25 = int_to_ptr.vmem [resolvable:$true] %s92_s25 }
  0x3a   :  { %s1109_s26 = scalar_lea.vmem %s93_s25, 1024  ;;  %p1114_p12 = scmp.lt.s32.totalorder %s93_s25, %s93_s25 }
  0x3b   :  { %p1110_p11 = scmp.ne.s32.totalorder %s93_s25, %s1109_s26  ;;  %p1115_p13 = scmp.lt.s32.totalorder %s1109_s26, %s1109_s26 }
  0x3d   :  { %p1116_p0 = por %p1115_p13, %p1114_p12 }
  0x3f   :  { %p1117_p1 = pnand %p1116_p0, %p1110_p11 }
  0x41   :  { %1120 = shalt.err (!%p1117_p1)
}
  0x42   :  { %98 = dma.hbm_to_vmem [thread:$0]  %s1332_s9, 1024, %s93_s25, [#allocation12], %s1152_s20, %s1152_s20, %s1153_s21  }
  0x43   :  { %1141 = dma.done.wait [#allocation3], 128  }
  0x44   :  { %1142 = vsyncadd [#allocation3], 4294967168 }
  0x45   :  { %1143 = dma.done.wait [#allocation6], 2048  }
  0x46   :  { %1144 = vsyncadd [#allocation6], 4294965248 }
  0x47   :  { %1145 = dma.done.wait [#allocation9], 2048  }
  0x48   :  { %1146 = vsyncadd [#allocation9], 4294965248 }
  0x49   :  { %1147 = dma.done.wait [#allocation12], 1024  }
  0x4a   :  { %1148 = vsyncadd [#allocation12], 4294966272  ;;  %v1159_v0 = vmov 0.0   ;;  %vm1160_vm0 = vmmov 0   ;;  %v951_v1 = vld [vmem:[#allocation5 + $0x38] sm:$0xff]   ;;  %v952_v2 = vld [vmem:[#allocation5 + $0x30] sm:$0xff]  }
  0x4b   :  { %840 = vmatprep.subr.bf16.mxu0 %v1159_v0  ;;  %856 = vmatprep.mubr.msk.bf16.mxu0 %vm1160_vm0, %v1159_v0  ;;  %v953_v3 = vld [vmem:[#allocation5 + $0x28] sm:$0xff]   ;;  %v954_v4 = vld [vmem:[#allocation5 + $0x20] sm:$0xff]   ;;  %v955_v5 = vld [vmem:[#allocation5 + $0x18] sm:$0xff]   ;;  %s1161_s30 = smov [#allocation13]  }
  0x4c   :  { %860 = vmatprep.subr.bf16.mxu1 %v1159_v0  ;;  %876 = vmatprep.mubr.msk.bf16.mxu1 %vm1160_vm0, %v1159_v0  ;;  %v956_v6 = vld [vmem:[#allocation5 + $0x10] sm:$0xff]   ;;  %v957_v7 = vld [vmem:[#allocation5 + $0x8] sm:$0xff]   ;;  %v958_v8 = vld [vmem:[#allocation5] sm:$0xff]   ;;  %s738_s1 = sshll.u32 %s1161_s30, 4  ;;  %s739_s1 = int_to_ptr.vmem [resolvable:$true] %s738_s1 }
  0x4d   :  { %841 = vmatpush3.bf16.msra.mxu0 %v951_v1  ;;  %v120_v9 = vld [vmem:[#allocation2] sm:$0xff]  ;;  %v960_v12 = vld [vmem:[#allocation7 + $0x30] sm:$0xff]   ;;  %v961_v13 = vld [vmem:[#allocation7 + $0x28] sm:$0xff]   ;;  %p1126_p3 = scmp.lt.s32.totalorder %s739_s1, %s739_s1 }
  0x4e   :  { %842 = vmatprep.subr.bf16.mxu0 %v1159_v0  ;;  %v121_v10 = vpack.c.bf16 %v120_v9, %v120_v9  ;;  %v959_v11 = vld [vmem:[#allocation7 + $0x38] sm:$0xff]   ;;  %v962_v14 = vld [vmem:[#allocation7 + $0x20] sm:$0xff]   ;;  %v964_v16 = vld [vmem:[#allocation7 + $0x10] sm:$0xff]  }
  0x4f   :  { %861 = vmatpush3.bf16.msra.mxu1 %v959_v11  ;;  %v963_v15 = vld [vmem:[#allocation7 + $0x18] sm:$0xff]   ;;  %v965_v17 = vld [vmem:[#allocation7 + $0x8] sm:$0xff]   ;;  %v966_v18 = vld [vmem:[#allocation7] sm:$0xff]  }
  0x50   :  { %862 = vmatprep.subr.bf16.mxu1 %v1159_v0  ;;  %v750_v19 = vld [vmem:[%s1325_s2] ss:$0 sm:$0xff]  ;;  %v968_v37 = vld [vmem:[#allocation8 + $0x30] sm:$0xff]   ;;  %v969_v38 = vld [vmem:[#allocation8 + $0x28] sm:$0xff]  }
  0x51   :  { %843 = vmatpush3.bf16.msra.mxu0 %v952_v2  ;;  %v967_v36 = vld [vmem:[#allocation8 + $0x38] sm:$0xff]   ;;  %v970_v39 = vld [vmem:[#allocation8 + $0x20] sm:$0xff]   ;;  %v972_v41 = vld [vmem:[#allocation8 + $0x10] sm:$0xff]  }
  0x52   :  { %844 = vmatprep.subr.bf16.mxu0 %v1159_v0  ;;  %v971_v40 = vld [vmem:[#allocation8 + $0x18] sm:$0xff]   ;;  %v973_v42 = vld [vmem:[#allocation8 + $0x8] sm:$0xff]   ;;  %v974_v43 = vld [vmem:[#allocation8] sm:$0xff]  }
  0x53   :  { %863 = vmatpush3.bf16.msra.mxu1 %v960_v12  ;;  %v759_v44 = vld [vmem:[%s1327_s4] ss:$0 sm:$0xff]  ;;  %v976_v62 = vld [vmem:[#allocation10 + $0x30] sm:$0xff]   ;;  %v977_v63 = vld [vmem:[#allocation10 + $0x28] sm:$0xff]  }
  0x54   :  { %864 = vmatprep.subr.bf16.mxu1 %v1159_v0  ;;  %v975_v61 = vld [vmem:[#allocation10 + $0x38] sm:$0xff]   ;;  %v978_v1 = vld [vmem:[#allocation10 + $0x20] sm:$0xff]  }
  0x55   :  { %845 = vmatpush3.bf16.msra.mxu0 %v953_v3  ;;  %v979_v2 = vld [vmem:[#allocation10 + $0x18] sm:$0xff]   ;;  %v980_v3 = vld [vmem:[#allocation10 + $0x10] sm:$0xff]  }
  0x56   :  { %846 = vmatprep.subr.bf16.mxu0 %v1159_v0 }
  0x57   :  { %865 = vmatpush3.bf16.msra.mxu1 %v961_v13 }
  0x58   :  { %866 = vmatprep.subr.bf16.mxu1 %v1159_v0 }
  0x59   :  { %847 = vmatpush3.bf16.msra.mxu0 %v954_v4  ;;  %v981_v4 = vld [vmem:[#allocation10 + $0x8] sm:$0xff]  }
  0x5a   :  { %848 = vmatprep.subr.bf16.mxu0 %v1159_v0 }
  0x5b   :  { %867 = vmatpush3.bf16.msra.mxu1 %v962_v14 }
  0x5c   :  { %868 = vmatprep.subr.bf16.mxu1 %v1159_v0 }
  0x5d   :  { %849 = vmatpush3.bf16.msra.mxu0 %v955_v5  ;;  %v982_v5 = vld [vmem:[#allocation10] sm:$0xff]  }
  0x5e   :  { %850 = vmatprep.subr.bf16.mxu0 %v1159_v0 }
  0x5f   :  { %869 = vmatpush3.bf16.msra.mxu1 %v963_v15 }
  0x60   :  { %870 = vmatprep.subr.bf16.mxu1 %v1159_v0 }
  0x61   :  { %851 = vmatpush3.bf16.msra.mxu0 %v956_v6  ;;  %v768_v6 = vld [vmem:[%s1329_s6] ss:$0 sm:$0xff] }
  0x62   :  { %852 = vmatprep.subr.bf16.mxu0 %v1159_v0 }
  0x63   :  { %871 = vmatpush3.bf16.msra.mxu1 %v964_v16 }
  0x64   :  { %872 = vmatprep.subr.bf16.mxu1 %v1159_v0 }
  0x65   :  { %853 = vmatpush3.bf16.msra.mxu0 %v957_v7 }
  0x66   :  { %854 = vmatprep.subr.bf16.mxu0 %v1159_v0 }
  0x67   :  { %873 = vmatpush3.bf16.msra.mxu1 %v965_v17 }
  0x68   :  { %874 = vmatprep.subr.bf16.mxu1 %v1159_v0 }
  0x69   :  { %855 = vmatpush3.bf16.msra.mxu0 %v958_v8 }
  0x6a   :  { %880 = vmatprep.subr.bf16.mxu0 %v1159_v0 }
  0x6b   :  { %875 = vmatpush3.bf16.msra.mxu1 %v966_v18 }
  0x6c   :  { %857 = vmatmul.mubr.bf16.vlgmr.msra.gmra.mxu0 %v121_v10  ;;  %900 = vmatprep.subr.bf16.mxu1 %v1159_v0 }
  0x6d   :  { %896 = vmatprep.mubr.msk.bf16.mxu0 %vm1160_vm0, %v1159_v0  ;;  %881 = vmatpush3.bf16.msra.mxu0 %v967_v36 }
  0x6e   :  { %882 = vmatprep.subr.bf16.mxu0 %v1159_v0 }
  0x71   :  { %883 = vmatpush3.bf16.msra.mxu0 %v968_v37 }
  0x72   :  { %884 = vmatprep.subr.bf16.mxu0 %v1159_v0 }
  0x75   :  { %885 = vmatpush3.bf16.msra.mxu0 %v969_v38 }
  0x76   :  { %886 = vmatprep.subr.bf16.mxu0 %v1159_v0 }
  0x79   :  { %887 = vmatpush3.bf16.msra.mxu0 %v970_v39 }
  0x7a   :  { %888 = vmatprep.subr.bf16.mxu0 %v1159_v0 }
  0x7d   :  { %889 = vmatpush3.bf16.msra.mxu0 %v971_v40 }
  0x7e   :  { %890 = vmatprep.subr.bf16.mxu0 %v1159_v0 }
  0x81   :  { %891 = vmatpush3.bf16.msra.mxu0 %v972_v41 }
  0x82   :  { %892 = vmatprep.subr.bf16.mxu0 %v1159_v0 }
  0x85   :  { %893 = vmatpush3.bf16.msra.mxu0 %v973_v42 }
  0x86   :  { %894 = vmatprep.subr.bf16.mxu0 %v1159_v0 }
  0x89   :  { %895 = vmatpush3.bf16.msra.mxu0 %v974_v43 }
  0x8a   :  { %920 = vmatprep.subr.bf16.mxu0 %v1159_v0 }
 0x12c   :  { %v227_v20 = vpop.f32.mrf.mxu0 }
 0x12d   :  { %v228_v21 = vadd.f32 %v750_v19, %v227_v20 }
 0x12e   :  { %v858_v22 = vpop.f32.mrf.mxu0 }
 0x12f   :  { %v234_v23 = vmul.f32 %v228_v21, %v228_v21  ;;  %v233_v31 = vmul.f32 0.5, %v228_v21 }
 0x130   :  { %v230_v24 = vpop.f32.mrf.mxu0 }
 0x131   :  { %v235_v25 = vmul.f32 %v234_v23, %v228_v21  ;;  %v983_v23 = vld [vmem:[#allocation11 + $0x38] sm:$0xff]   ;;  %v984_v24 = vld [vmem:[#allocation11 + $0x30] sm:$0xff]  }
 0x132   :  { %v859_v26 = vpop.f32.mrf.mxu0 }
 0x133   :  { %v236_v27 = vmul.f32 0.044715, %v235_v25  ;;  %v985_v25 = vld [vmem:[#allocation11 + $0x28] sm:$0xff]   ;;  %v986_v26 = vld [vmem:[#allocation11 + $0x20] sm:$0xff]  }
 0x135   :  { %v237_v28 = vadd.f32 %v236_v27, %v228_v21  ;;  %v987_v27 = vld [vmem:[#allocation11 + $0x18] sm:$0xff]  }
 0x137   :  { %v238_v29 = vmul.f32 0.7978846, %v237_v28  ;;  %v988_v28 = vld [vmem:[#allocation11 + $0x10] sm:$0xff]  }
 0x139   :  { %991 = vtanh.f32 %v238_v29  ;;  %v989_v29 = vld [vmem:[#allocation11 + $0x8] sm:$0xff]  }
 0x146   :  { %v992_v30 = vpop.eup %991 }
 0x147   :  { %v240_v32 = vadd.f32 1.0, %v992_v30  ;;  %v990_v30 = vld [vmem:[#allocation11] sm:$0xff]  }
 0x149   :  { %v241_v33 = vmul.f32 %v240_v32, %v233_v31  ;;  %v777_v31 = vld [vmem:[%s1331_s8] ss:$0 sm:$0xff] }
 0x14b   :  { %v242_v34 = vadd.f32 %v241_v33, %v120_v9 }
 0x14d   :  { %v243_v35 = vpack.c.bf16 %v242_v34, %v242_v34 }
 0x14f   :  { %877 = vmatmul.mubr.bf16.vlgmr.msra.gmra.mxu1 %v243_v35 }
 0x150   :  { %916 = vmatprep.mubr.msk.bf16.mxu1 %vm1160_vm0, %v1159_v0  ;;  %901 = vmatpush3.bf16.msra.mxu1 %v975_v61 }
 0x151   :  { %902 = vmatprep.subr.bf16.mxu1 %v1159_v0 }
 0x154   :  { %903 = vmatpush3.bf16.msra.mxu1 %v976_v62 }
 0x155   :  { %904 = vmatprep.subr.bf16.mxu1 %v1159_v0 }
 0x158   :  { %905 = vmatpush3.bf16.msra.mxu1 %v977_v63 }
 0x159   :  { %906 = vmatprep.subr.bf16.mxu1 %v1159_v0 }
 0x15c   :  { %907 = vmatpush3.bf16.msra.mxu1 %v978_v1 }
 0x15d   :  { %908 = vmatprep.subr.bf16.mxu1 %v1159_v0 }
 0x160   :  { %909 = vmatpush3.bf16.msra.mxu1 %v979_v2 }
 0x161   :  { %910 = vmatprep.subr.bf16.mxu1 %v1159_v0 }
 0x164   :  { %911 = vmatpush3.bf16.msra.mxu1 %v980_v3 }
 0x165   :  { %912 = vmatprep.subr.bf16.mxu1 %v1159_v0 }
 0x168   :  { %913 = vmatpush3.bf16.msra.mxu1 %v981_v4 }
 0x169   :  { %914 = vmatprep.subr.bf16.mxu1 %v1159_v0 }
 0x16c   :  { %915 = vmatpush3.bf16.msra.mxu1 %v982_v5 }
 0x20f   :  { %v349_v45 = vpop.f32.mrf.mxu1 }
 0x210   :  { %v350_v46 = vadd.f32 %v759_v44, %v349_v45 }
 0x211   :  { %v878_v47 = vpop.f32.mrf.mxu1 }
 0x212   :  { %v356_v48 = vmul.f32 %v350_v46, %v350_v46  ;;  %v355_v56 = vmul.f32 0.5, %v350_v46  ;;  %v786_v47 = vld [vmem:[%s1333_s10] ss:$0 sm:$0xff]  ;;  %s1121_s10 = scalar_lea.vmem %s739_s1, 128 }
 0x213   :  { %v352_v49 = vpop.f32.mrf.mxu1  ;;  %p1122_p2 = scmp.ne.s32.totalorder %s739_s1, %s1121_s10  ;;  %p1127_p4 = scmp.lt.s32.totalorder %s1121_s10, %s1121_s10 }
 0x214   :  { %v357_v50 = vmul.f32 %v356_v48, %v350_v46 }
 0x215   :  { %v879_v51 = vpop.f32.mrf.mxu1  ;;  %p1128_p5 = por %p1127_p4, %p1126_p3 }
 0x216   :  { %v358_v52 = vmul.f32 0.044715, %v357_v50 }
 0x217   :  { %p1129_p6 = pnand %p1128_p5, %p1122_p2 }
 0x218   :  { %v359_v53 = vadd.f32 %v358_v52, %v350_v46 }
 0x21a   :  { %v360_v54 = vmul.f32 0.7978846, %v359_v53 }
 0x21c   :  { %993 = vtanh.f32 %v360_v54 }
 0x229   :  { %v994_v55 = vpop.eup %993 }
 0x22a   :  { %v362_v57 = vadd.f32 1.0, %v994_v55 }
 0x22c   :  { %v363_v58 = vmul.f32 %v362_v57, %v355_v56 }
 0x22e   :  { %v364_v59 = vadd.f32 %v363_v58, %v242_v34 }
 0x230   :  { %v365_v60 = vpack.c.bf16 %v364_v59, %v364_v59 }
 0x232   :  { %897 = vmatmul.mubr.bf16.vlgmr.msra.gmra.mxu0 %v365_v60 }
 0x233   :  { %936 = vmatprep.mubr.msk.bf16.mxu0 %vm1160_vm0, %v1159_v0  ;;  %921 = vmatpush3.bf16.msra.mxu0 %v983_v23 }
 0x234   :  { %922 = vmatprep.subr.bf16.mxu0 %v1159_v0 }
 0x237   :  { %923 = vmatpush3.bf16.msra.mxu0 %v984_v24 }
 0x238   :  { %924 = vmatprep.subr.bf16.mxu0 %v1159_v0 }
 0x23b   :  { %925 = vmatpush3.bf16.msra.mxu0 %v985_v25 }
 0x23c   :  { %926 = vmatprep.subr.bf16.mxu0 %v1159_v0 }
 0x23f   :  { %927 = vmatpush3.bf16.msra.mxu0 %v986_v26 }
 0x240   :  { %928 = vmatprep.subr.bf16.mxu0 %v1159_v0 }
 0x243   :  { %929 = vmatpush3.bf16.msra.mxu0 %v987_v27 }
 0x244   :  { %930 = vmatprep.subr.bf16.mxu0 %v1159_v0 }
 0x247   :  { %931 = vmatpush3.bf16.msra.mxu0 %v988_v28 }
 0x248   :  { %932 = vmatprep.subr.bf16.mxu0 %v1159_v0 }
 0x24b   :  { %933 = vmatpush3.bf16.msra.mxu0 %v989_v29 }
 0x24c   :  { %934 = vmatprep.subr.bf16.mxu0 %v1159_v0 }
 0x24f   :  { %935 = vmatpush3.bf16.msra.mxu0 %v990_v30 }
 0x2f2   :  { %v471_v7 = vpop.f32.mrf.mxu0 }
 0x2f3   :  { %v472_v8 = vadd.f32 %v768_v6, %v471_v7 }
 0x2f4   :  { %v898_v9 = vpop.f32.mrf.mxu0 }
 0x2f5   :  { %v478_v10 = vmul.f32 %v472_v8, %v472_v8  ;;  %v477_v18 = vmul.f32 0.5, %v472_v8 }
 0x2f6   :  { %v474_v11 = vpop.f32.mrf.mxu0 }
 0x2f7   :  { %v479_v12 = vmul.f32 %v478_v10, %v472_v8 }
 0x2f8   :  { %v899_v13 = vpop.f32.mrf.mxu0 }
 0x2f9   :  { %v480_v14 = vmul.f32 0.044715, %v479_v12 }
 0x2fb   :  { %v481_v15 = vadd.f32 %v480_v14, %v472_v8 }
 0x2fd   :  { %v482_v16 = vmul.f32 0.7978846, %v481_v15 }
 0x2ff   :  { %995 = vtanh.f32 %v482_v16 }
 0x30c   :  { %v996_v17 = vpop.eup %995 }
 0x30d   :  { %v484_v19 = vadd.f32 1.0, %v996_v17 }
 0x30f   :  { %v485_v20 = vmul.f32 %v484_v19, %v477_v18 }
 0x311   :  { %v486_v21 = vadd.f32 %v485_v20, %v364_v59 }
 0x313   :  { %v487_v22 = vpack.c.bf16 %v486_v21, %v486_v21 }
 0x315   :  { %917 = vmatmul.mubr.bf16.vlgmr.msra.gmra.mxu1 %v487_v22 }
 0x3d5   :  { %v593_v32 = vpop.f32.mrf.mxu1 }
 0x3d6   :  { %v594_v33 = vadd.f32 %v777_v31, %v593_v32 }
 0x3d7   :  { %v918_v34 = vpop.f32.mrf.mxu1 }
 0x3d8   :  { %v600_v35 = vmul.f32 %v594_v33, %v594_v33  ;;  %v599_v43 = vmul.f32 0.5, %v594_v33 }
 0x3d9   :  { %v596_v36 = vpop.f32.mrf.mxu1 }
 0x3da   :  { %v601_v37 = vmul.f32 %v600_v35, %v594_v33 }
 0x3db   :  { %v919_v38 = vpop.f32.mrf.mxu1 }
 0x3dc   :  { %v602_v39 = vmul.f32 0.044715, %v601_v37 }
 0x3de   :  { %v603_v40 = vadd.f32 %v602_v39, %v594_v33 }
 0x3e0   :  { %v604_v41 = vmul.f32 0.7978846, %v603_v40 }
 0x3e2   :  { %997 = vtanh.f32 %v604_v41 }
 0x3ef   :  { %v998_v42 = vpop.eup %997 }
 0x3f0   :  { %v606_v0 = vadd.f32 1.0, %v998_v42 }
 0x3f2   :  { %v607_v44 = vmul.f32 %v606_v0, %v599_v43 }
 0x3f4   :  { %v608_v45 = vadd.f32 %v607_v44, %v486_v21 }
 0x3f6   :  { %v609_v46 = vpack.c.bf16 %v608_v45, %v608_v45 }
 0x3f8   :  { %937 = vmatmul.mubr.bf16.vlgmr.msra.gmra.mxu0 %v609_v46 }
 0x4b8   :  { %v715_v48 = vpop.f32.mrf.mxu0 }
 0x4b9   :  { %v716_v49 = vadd.f32 %v786_v47, %v715_v48 }
 0x4ba   :  { %v938_v50 = vpop.f32.mrf.mxu0 }
 0x4bb   :  { %v722_v51 = vmul.f32 %v716_v49, %v716_v49  ;;  %v721_v59 = vmul.f32 0.5, %v716_v49 }
 0x4bc   :  { %v718_v52 = vpop.f32.mrf.mxu0 }
 0x4bd   :  { %v723_v53 = vmul.f32 %v722_v51, %v716_v49 }
 0x4be   :  { %v939_v54 = vpop.f32.mrf.mxu0 }
 0x4bf   :  { %v724_v55 = vmul.f32 0.044715, %v723_v53 }
 0x4c1   :  { %v725_v56 = vadd.f32 %v724_v55, %v716_v49 }
 0x4c3   :  { %v726_v57 = vmul.f32 0.7978846, %v725_v56 }
 0x4c5   :  { %999 = vtanh.f32 %v726_v57 }
 0x4d2   :  { %v1000_v58 = vpop.eup %999 }
 0x4d3   :  { %v728_v60 = vadd.f32 1.0, %v1000_v58 }
 0x4d5   :  { %v729_v61 = vmul.f32 %v728_v60, %v721_v59 }
 0x4d7   :  { %v730_v62 = vadd.f32 %v729_v61, %v608_v45 }
 0x4d9   :  { %731 = vst [vmem:[#allocation13] sm:$0xff] %v730_v62 }
 0x4da   :  { %1132 = shalt.err (!%p1129_p6)
}
 0x4db   :  { %741 = dma.vmem_to_hbm [thread:$0]  %s739_s1, 128, %s1334_s11, [#allocation4]  }
 0x4dc   :  { %1149 = dma.done.wait [#allocation4], 128  }
 0x4dd   :  { %1150 = vsyncadd [#allocation4], 4294967168 }
 0x4de   :  { %745 = vsyncpa [#allocation3], 1 }
 0x4df   :  { %746 = vsyncpa [#allocation6], 1 }
 0x4e0   :  { %747 = vsyncpa [#allocation9], 1 }
 0x4e1   :  { %748 = vsyncpa [#allocation12], 1 }
 0x4e2   :  { %749 = vsyncpa [#allocation4], 1 }

</bundles_post_ra>
